<compile_context>
chip_gen: v7x
topology: tpu7x:2x2x1
jax: 0.10.0
libtpu: 0.0.40
codegen_flags: <defaults>
</compile_context>

<pallas_src>
import functools

import jax
import jax.numpy as jnp
from jax import lax
from jax.experimental import pallas as pl
from jax.experimental.pallas import tpu as pltpu


def _cdiv(a, b):
    return -(-a // b)


def _round_up(a, b):
    return _cdiv(a, b) * b


def _use_bf16_exp():
    """bf16 EUP exists on v6e/v7x; keep f32 exp on v5e and older chips."""
    try:
        kind = jax.devices()[0].device_kind.lower()
    except Exception:
        return False
    return not any(old in kind for old in ("v2", "v3", "v4", "v5"))


# ---------------------------------------------------------------------------
# Prologue: fused LayerNorm, f32 feature in -> bf16 xn out (read exactly once).
# ---------------------------------------------------------------------------
def layernorm_kernel(x_ref, gamma_ref, beta_ref, xn_ref, *, eps):
    x = x_ref[0].astype(jnp.float32)                 # (t, C)
    gamma = gamma_ref[0]                             # (C,) f32
    beta = beta_ref[0]                               # (C,) f32
    mean = jnp.mean(x, axis=-1, keepdims=True)
    c = x - mean
    var = jnp.mean(c * c, axis=-1, keepdims=True)    # biased, like torch LayerNorm
    xn_ref[0] = (c * lax.rsqrt(var + eps) * gamma + beta).astype(xn_ref.dtype)


# ---------------------------------------------------------------------------
# Main path: kv fully VMEM-resident, plain softmax per q tile.
# ---------------------------------------------------------------------------
def pct_attn_resident_kernel(xq_ref, xkv_ref, out_ref, *,
                             scale, n_real, use_bf16_exp):
    xq = xq_ref[0]            # (tq, C)    bf16 q tile
    xkv = xkv_ref[0]          # (N_pad, C) bf16 whole (padded) sequence, resident

    # Scores: NT contraction over channels on the MXU, f32 accumulation.
    s = lax.dot_general(xq, xkv,
                        dimension_numbers=(((1,), (1,)), ((), ())),
                        preferred_element_type=jnp.float32) * scale   # (tq, N_pad)

    n_pad = xkv.shape[0]
    if n_real < n_pad:        # mask padded kv columns (trace-time condition)
        col = lax.broadcasted_iota(jnp.int32, s.shape, 1)
        s = jnp.where(col < n_real, s, -jnp.inf)

    m = jnp.max(s, axis=-1, keepdims=True)
    z = s - m
    if use_bf16_exp:          # v6e/v7x: bf16 EUP ~2x throughput; p feeds bf16 MXU anyway
        p = jnp.exp(z.astype(jnp.bfloat16))
        l = jnp.sum(p.astype(jnp.float32), axis=-1, keepdims=True)
    else:                     # v5e and older: f32 exp
        p32 = jnp.exp(z)
        l = jnp.sum(p32, axis=-1, keepdims=True)
        p = p32.astype(jnp.bfloat16)

    inv_l = pl.reciprocal(l, approx=True)            # EUP vrcp
    av = jnp.dot(p, xkv, preferred_element_type=jnp.float32)
    out_ref[0] = (av * inv_l + xq.astype(jnp.float32)).astype(out_ref.dtype)


# ---------------------------------------------------------------------------
# Fallback path: flash-style streaming online softmax (kv too big for VMEM).
# ---------------------------------------------------------------------------
def pct_attn_flash_kernel(xq_ref, xkv_ref, out_ref, m_sc, l_sc, acc_sc, *,
                          scale, n_real, n_pad, tkv, use_bf16_exp):
    ki = pl.program_id(2)
    n_kv = pl.num_programs(2)

    @pl.when(ki == 0)
    def _init():
        m_sc[...] = jnp.full_like(m_sc, -jnp.inf)
        l_sc[...] = jnp.zeros_like(l_sc)
        acc_sc[...] = jnp.zeros_like(acc_sc)

    xq = xq_ref[0]            # (tq, C)  bf16
    xkv = xkv_ref[0]          # (tkv, C) bf16

    s = lax.dot_general(xq, xkv,
                        dimension_numbers=(((1,), (1,)), ((), ())),
                        preferred_element_type=jnp.float32) * scale   # (tq, tkv)

    if n_real < n_pad:        # only the tail kv tile contains padding
        col = ki * tkv + lax.broadcasted_iota(jnp.int32, s.shape, 1)
        s = jnp.where(col < n_real, s, -jnp.inf)

    m_prev = m_sc[...]
    m_new = jnp.maximum(m_prev, jnp.max(s, axis=-1, keepdims=True))
    alpha = jnp.exp(m_prev - m_new)
    z = s - m_new
    if use_bf16_exp:
        p = jnp.exp(z.astype(jnp.bfloat16))
        p_sum = jnp.sum(p.astype(jnp.float32), axis=-1, keepdims=True)
    else:
        p32 = jnp.exp(z)
        p_sum = jnp.sum(p32, axis=-1, keepdims=True)
        p = p32.astype(jnp.bfloat16)

    l_sc[...] = alpha * l_sc[...] + p_sum
    acc_sc[...] = alpha * acc_sc[...] + jnp.dot(
        p, xkv, preferred_element_type=jnp.float32)
    m_sc[...] = m_new

    @pl.when(ki == n_kv - 1)
    def _finalize():
        inv_l = pl.reciprocal(l_sc[...], approx=True)
        out_ref[0] = (acc_sc[...] * inv_l
                      + xq.astype(jnp.float32)).astype(out_ref.dtype)


# ---------------------------------------------------------------------------
# Wrapper
# ---------------------------------------------------------------------------
def pct_forward(feature, gamma, beta, *, eps=1e-5,
                max_q_tile=256, max_kv_tile=1024, force_flash=False):
    """feature: (B, N, C) float32; gamma/beta: (C,) LayerNorm affine params."""
    B, N, C = feature.shape
    scale = float(C) ** (-0.5)
    use_bf16_exp = _use_bf16_exp()

    # ---- q-tile / padding selection --------------------------------------
    # >= 2 q blocks when B == 1 (v7x has 2 TensorCores sharded over "parallel"
    # axes); tiles are multiples of 8 sublanes; N is padded to a tile multiple.
    n_q_blocks = max(_cdiv(N, max_q_tile), 2 if B == 1 else 1)
    n_q_blocks = min(n_q_blocks, max(_cdiv(N, 8), 1))
    tq = _round_up(_cdiv(N, n_q_blocks), 8)
    n_pad = tq * n_q_blocks

    feature_p = feature
    if n_pad != N:
        feature_p = jnp.pad(feature, ((0, 0), (0, n_pad - N), (0, 0)))

    gamma2 = gamma.reshape(1, C).astype(jnp.float32)
    beta2 = beta.reshape(1, C).astype(jnp.float32)

    # ---- prologue: xn = LayerNorm(feature) once, stored as bf16 -----------
    xn = pl.pallas_call(
        functools.partial(layernorm_kernel, eps=eps),
        out_shape=jax.ShapeDtypeStruct((B, n_pad, C), jnp.bfloat16),
        grid=(B, n_pad // tq),
        in_specs=[
            pl.BlockSpec((1, tq, C), lambda b, i: (b, i, 0)),
            pl.BlockSpec((1, C), lambda b, i: (0, 0)),
            pl.BlockSpec((1, C), lambda b, i: (0, 0)),
        ],
        out_specs=pl.BlockSpec((1, tq, C), lambda b, i: (b, i, 0)),
        compiler_params=pltpu.CompilerParams(
            dimension_semantics=("parallel", "parallel")),
    )(feature_p, gamma2, beta2)

    # ---- attention: VMEM-resident kv (default) or streaming flash ---------
    kv_bytes = n_pad * C * 2
    resident_footprint = (
        2 * kv_bytes                      # resident kv (double-buffered bf16)
        + 2 * tq * C * (2 + 4)            # q-in (bf16) + out (f32) tiles
        + tq * n_pad * (4 + 4 + 2)        # scores f32 + mask temps + p bf16
        + 4 * tq * C * 4)                 # misc f32 temporaries
    resident_ok = (not force_flash) and resident_footprint <= (40 << 20)

    if resident_ok:
        vmem_limit = int(min(max(resident_footprint + (4 << 20), 16 << 20),
                             56 << 20))
        out_p = pl.pallas_call(
            functools.partial(pct_attn_resident_kernel, scale=scale,
                              n_real=N, use_bf16_exp=use_bf16_exp),
            out_shape=jax.ShapeDtypeStruct((B, n_pad, C), feature.dtype),
            grid=(B, n_pad // tq),
            in_specs=[
                pl.BlockSpec((1, tq, C), lambda b, qi: (b, qi, 0)),     # q tile
                pl.BlockSpec((1, n_pad, C), lambda b, qi: (b, 0, 0)),   # kv resident
            ],
            out_specs=pl.BlockSpec((1, tq, C), lambda b, qi: (b, qi, 0)),
            compiler_params=pltpu.CompilerParams(
                dimension_semantics=("parallel", "parallel"),
                vmem_limit_bytes=vmem_limit),
        )(xn, xn)
    else:
        # kv tile: largest multiple of tq that divides n_pad and fits max_kv_tile.
        tkv = tq
        for mult in (8, 4, 2):
            if n_q_blocks % mult == 0 and tq * mult <= max_kv_tile:
                tkv = tq * mult
                break
        flash_footprint = (
            2 * tq * C * (2 + 4) + 2 * tkv * C * 2
            + tq * tkv * (4 + 4 + 2) + 4 * tq * C * 4 + 4 * tq * 4)
        vmem_limit = int(min(max(flash_footprint + (4 << 20), 16 << 20),
                             56 << 20))
        out_p = pl.pallas_call(
            functools.partial(pct_attn_flash_kernel, scale=scale, n_real=N,
                              n_pad=n_pad, tkv=tkv, use_bf16_exp=use_bf16_exp),
            out_shape=jax.ShapeDtypeStruct((B, n_pad, C), feature.dtype),
            grid=(B, n_pad // tq, n_pad // tkv),
            in_specs=[
                pl.BlockSpec((1, tq, C), lambda b, qi, ki: (b, qi, 0)),
                pl.BlockSpec((1, tkv, C), lambda b, qi, ki: (b, ki, 0)),
            ],
            out_specs=pl.BlockSpec((1, tq, C), lambda b, qi, ki: (b, qi, 0)),
            scratch_shapes=[
                pltpu.VMEM((tq, 1), jnp.float32),   # running row max
                pltpu.VMEM((tq, 1), jnp.float32),   # running row sum
                pltpu.VMEM((tq, C), jnp.float32),   # unnormalized attn @ v
            ],
            compiler_params=pltpu.CompilerParams(
                dimension_semantics=("parallel", "parallel", "arbitrary"),
                vmem_limit_bytes=vmem_limit),
        )(xn, xn)

    if n_pad != N:
        out_p = out_p[:, :N, :]
    return out_p


def pct_reference(feature, gamma, beta, *, eps=1e-5):
    """Pure-JAX f32 reference for correctness checks."""
    C = feature.shape[-1]
    mean = jnp.mean(feature, axis=-1, keepdims=True)
    var = jnp.mean((feature - mean) ** 2, axis=-1, keepdims=True)
    xn = (feature - mean) / jnp.sqrt(var + eps) * gamma + beta
    dots = jnp.einsum("bnc,bmc->bnm", xn, xn) * (C ** -0.5)
    attn = jax.nn.softmax(dots, axis=-1)
    return jnp.einsum("bnm,bmc->bnc", attn, xn) + xn


if __name__ == "__main__":
    # Small shapes consistent with PCT: batch=2, seq=32, channels=32.
    B, N, C = 2, 32, 32
    key = jax.random.PRNGKey(0)
    k1, k2, k3 = jax.random.split(key, 3)
    feature = jax.random.normal(k1, (B, N, C), dtype=jnp.float32)
    # Non-trivial LayerNorm affine params to exercise the gamma/beta path.
    gamma = 1.0 + 0.1 * jax.random.normal(k2, (C,), dtype=jnp.float32)
    beta = 0.1 * jax.random.normal(k3, (C,), dtype=jnp.float32)

    ref = pct_reference(feature, gamma, beta)

    # 1) Default resident-kv path.
    out = jax.block_until_ready(pct_forward(feature, gamma, beta))
    assert out.shape == (B, N, C)
    # bf16 MXU operands / bf16 xn -> relaxed tolerance vs. the f32 reference.
    assert jnp.allclose(out, ref, atol=5e-2, rtol=5e-2), "mismatch (resident)"

    # 2) Non-multiple-of-8 N with B=1: exercises tail padding + column masking
    #    and the >=2-q-block split used for v7x's two TensorCores.
    f2 = jax.random.normal(jax.random.PRNGKey(1), (1, 20, C), dtype=jnp.float32)
    ref2 = pct_reference(f2, gamma, beta)
    out2 = jax.block_until_ready(pct_forward(f2, gamma, beta))
    assert out2.shape == (1, 20, C)
    assert jnp.allclose(out2, ref2, atol=5e-2, rtol=5e-2), "mismatch (padded)"

    # 3) Force the streaming flash fallback (online-softmax accumulator path).
    out3 = jax.block_until_ready(
        pct_forward(feature, gamma, beta, force_flash=True,
                    max_q_tile=8, max_kv_tile=8))
    assert jnp.allclose(out3, ref, atol=5e-2, rtol=5e-2), "mismatch (flash)"

    print("KERNEL_OK")
</pallas_src>

<mosaic_0001>
module attributes {stable_mosaic.version = 11 : i64} {
  func.func @layernorm_kernel(%arg0: i32, %arg1: i32, %arg2: memref<1x32x32xf32, #tpu.memory_space<vmem>>, %arg3: memref<1x32xf32, #tpu.memory_space<vmem>>, %arg4: memref<1x32xf32, #tpu.memory_space<vmem>>, %arg5: memref<1x32x32xbf16, #tpu.memory_space<vmem>>) attributes {dimension_semantics = [#tpu.dimension_semantics<parallel>, #tpu.dimension_semantics<parallel>], iteration_bounds = array<i64: 2, 1>, scalar_prefetch = 0 : i64, scratch_operands = 0 : i64, tpu.core_type = #tpu.core_type<tc>, window_params = [{transform_indices = @transform_0, window_bounds = array<i64: 1, 32, 32>}, {pipeline_mode = #tpu.pipeline_mode<synchronous>, transform_indices = @transform_1, window_bounds = array<i64: 1, 32>}, {pipeline_mode = #tpu.pipeline_mode<synchronous>, transform_indices = @transform_2, window_bounds = array<i64: 1, 32>}, {transform_indices = @transform_3, window_bounds = array<i64: 1, 32, 32>}]} {
    %c0 = arith.constant 0 : index
    %c0_0 = arith.constant 0 : index
    %c0_1 = arith.constant 0 : index
    %0 = vector.load %arg2[%c0, %c0_0, %c0_1] : memref<1x32x32xf32, #tpu.memory_space<vmem>>, vector<1x32x32xf32>
    %1 = vector.shape_cast %0 : vector<1x32x32xf32> to vector<32x32xf32>
    %c0_2 = arith.constant 0 : index
    %c0_3 = arith.constant 0 : index
    %2 = vector.load %arg3[%c0_2, %c0_3] : memref<1x32xf32, #tpu.memory_space<vmem>>, vector<1x32xf32>
    %3 = vector.shape_cast %2 : vector<1x32xf32> to vector<32xf32>
    %c0_4 = arith.constant 0 : index
    %c0_5 = arith.constant 0 : index
    %4 = vector.load %arg4[%c0_4, %c0_5] : memref<1x32xf32, #tpu.memory_space<vmem>>, vector<1x32xf32>
    %5 = vector.shape_cast %4 : vector<1x32xf32> to vector<32xf32>
    %cst = arith.constant dense<0.000000e+00> : vector<32xf32>
    %6 = vector.multi_reduction <add>, %1, %cst [1] : vector<32x32xf32> to vector<32xf32>
    %7 = vector.shape_cast %6 : vector<32xf32> to vector<32x1xf32>
    %cst_6 = arith.constant 3.200000e+01 : f32
    %8 = vector.broadcast %cst_6 : f32 to vector<32x1xf32>
    %9 = arith.divf %7, %8 : vector<32x1xf32>
    %10 = vector.broadcast %9 : vector<32x1xf32> to vector<32x32xf32>
    %11 = arith.subf %1, %10 : vector<32x32xf32>
    %12 = arith.mulf %11, %11 : vector<32x32xf32>
    %cst_7 = arith.constant dense<0.000000e+00> : vector<32xf32>
    %13 = vector.multi_reduction <add>, %12, %cst_7 [1] : vector<32x32xf32> to vector<32xf32>
    %14 = vector.shape_cast %13 : vector<32xf32> to vector<32x1xf32>
    %cst_8 = arith.constant 3.200000e+01 : f32
    %15 = vector.broadcast %cst_8 : f32 to vector<32x1xf32>
    %16 = arith.divf %14, %15 : vector<32x1xf32>
    %cst_9 = arith.constant 9.99999974E-6 : f32
    %17 = vector.broadcast %cst_9 : f32 to vector<32x1xf32>
    %18 = arith.addf %16, %17 : vector<32x1xf32>
    %19 = math.rsqrt %18 : vector<32x1xf32>
    %20 = vector.broadcast %19 : vector<32x1xf32> to vector<32x32xf32>
    %21 = arith.mulf %11, %20 : vector<32x32xf32>
    %22 = vector.shape_cast %3 : vector<32xf32> to vector<1x32xf32>
    %23 = vector.broadcast %22 : vector<1x32xf32> to vector<32x32xf32>
    %24 = arith.mulf %21, %23 : vector<32x32xf32>
    %25 = vector.shape_cast %5 : vector<32xf32> to vector<1x32xf32>
    %26 = vector.broadcast %25 : vector<1x32xf32> to vector<32x32xf32>
    %27 = arith.addf %24, %26 : vector<32x32xf32>
    %28 = arith.truncf %27 : vector<32x32xf32> to vector<32x32xbf16>
    %c0_10 = arith.constant 0 : index
    %c0_11 = arith.constant 0 : index
    %c0_12 = arith.constant 0 : index
    %29 = vector.load %arg5[%c0_10, %c0_11, %c0_12] : memref<1x32x32xbf16, #tpu.memory_space<vmem>>, vector<1x32x32xbf16>
    %30 = vector.shape_cast %29 : vector<1x32x32xbf16> to vector<32x32xbf16>
    %31 = vector.shape_cast %28 : vector<32x32xbf16> to vector<1x32x32xbf16>
    tpu.vector_store %arg5[%c0_10, %c0_11, %c0_12], %31 {strides = array<i32>} : memref<1x32x32xbf16, #tpu.memory_space<vmem>>, vector<1x32x32xbf16>,
    return
  }
  func.func @transform_0(%arg0: i32, %arg1: i32) -> (i32, i32, i32) {
    %c0_i32 = arith.constant 0 : i32
    %c0_i32_0 = arith.constant 0 : i32
    return %arg0, %arg1, %c0_i32 : i32, i32, i32
  }
  func.func @transform_1(%arg0: i32, %arg1: i32) -> (i32, i32) {
    %c0_i32 = arith.constant 0 : i32
    %c0_i32_0 = arith.constant 0 : i32
    %c0_i32_1 = arith.constant 0 : i32
    return %c0_i32, %c0_i32_0 : i32, i32
  }
  func.func @transform_2(%arg0: i32, %arg1: i32) -> (i32, i32) {
    %c0_i32 = arith.constant 0 : i32
    %c0_i32_0 = arith.constant 0 : i32
    %c0_i32_1 = arith.constant 0 : i32
    return %c0_i32, %c0_i32_0 : i32, i32
  }
  func.func @transform_3(%arg0: i32, %arg1: i32) -> (i32, i32, i32) {
    %c0_i32 = arith.constant 0 : i32
    %c0_i32_0 = arith.constant 0 : i32
    return %arg0, %arg1, %c0_i32 : i32, i32, i32
  }
}

</mosaic_0001>

<bundles_post_ra>
// kernel: tpu_custom_call.1
= control target key start
LH: loop header
LB: loop body
LE: loop exit
PB: predicated region body
PF: predicated region fallthrough
CT: control target
= control target key end

     0   :  { %8 = vsyncpa [#allocation3], 0  ;;  %s848_s0 = inlined_call_operand.hbm [shape: f32[2,32,32], index: 0, kind: input, shape index: {}]   ;;  %s849_s1 = inlined_call_operand.vmem [shape: f32[1,32], index: 1, kind: input, shape index: {}]   ;;  %s850_s2 = inlined_call_operand.vmem [shape: f32[1,32], index: 2, kind: input, shape index: {}]   ;;  %s851_s3 = inlined_call_operand.hbm [shape: bf16[2,32,32], index: 3, kind: output, shape index: {}]  }
   0x1   :  { %10 = vsyncpa [#allocation3 + $0x1], 0 }
   0x2   :  { %11 = vsyncpa [#allocation4], 0 }
   0x3   :  { %13 = vsyncpa [#allocation4 + $0x1], 0  ;;  %s654_s12 = smov 0   ;;  %s656_s13 = smov 0  }
   0x4   :  { %s658_s14 = smov 0   ;;  %s660_s15 = smov 0  }
   0x5   :  { %s662_s16 = smov 0   ;;  %s664_s17 = smov 0  }
   0x6 LB: > { %s413_s18 = sadd.s32 4294967295, %s626_s17   ;;  %s414_s19 = sadd.s32 4294967294, %s626_s17   ;;  %s626_s17 = sphi %s664_s17, %s19_s17   ;;  %s622_s16 = sphi %s662_s16, %s866_s16   ;;  %s618_s15 = sphi %s660_s15, %s865_s15   ;;  %s614_s14 = sphi %s658_s14, %s864_s14   ;;  %s610_s13 = sphi %s656_s13, %s863_s13   ;;  %s606_s12 = sphi %s654_s12, %s862_s12  }
   0x7   : > { %s31_s20 = sadd.s32 1, %s622_s16  ;;  %s40_s21 = sadd.s32 1, %s614_s14 }
   0x8   : > { %p33_p0 = scmp.ge.s32.totalorder %s31_s20, 2  ;;  %p47_p1 = scmp.ne.s32.totalorder %s614_s14, %s610_s13 }
   0x9   : > { %p48_p2 = scmp.eq.s32.totalorder %s626_s17, 0  ;;  %p53_p3 = scmp.ne.s32.totalorder %s610_s13, %s606_s12 }
   0xa   : > { %s868_s20 = smov (%p33_p0, %s31_s20), 0  ;;  %p54_p5 = scmp.eq.s32.totalorder %s413_s18, 0 }
   0xb   : > { %p695_p4 = por %p48_p2, %p47_p1  ;;  %s35_s23 = ssub.s32 %s622_s16, %s868_s20 }
   0xc   : > { %p121_p6 = scmp.eq.s32.totalorder %s413_s18, 1  ;;  %p38_p7 = scmp.eq.s32.totalorder %s35_s23, 0 }
   0xd   : > { %p701_p8 = por %p54_p5, %p53_p3  ;;  %p127_p10 = scmp.eq.s32.totalorder %s414_s19, 1 }
   0xe   : > { %p705_p9 = por %p121_p6, %p47_p1  ;;  %p452_p13 = scmp.lt.s32.totalorder %s626_s17, 2 }
   0xf   : > { %s710_s26 = scalar_select %p38_p7, %s614_s14, %s40_s21  }
  0x10   : > { %s855_s25 = scalar_select %p705_p9, 1, 0 }
  0x11   : > { %p712_p11 = por %p127_p10, %p53_p3  ;;  %s153_s28 = sand.u32 1, %s614_s14  }
  0x12   : > { %s417_s29 = sshll.u32 %s153_s28, 5  ;;  %s434_s30 = sshll.u32 %s622_s16, 9 }
  0x13   : > { %s856_s27 = scalar_select %p712_p11, 1, 0 }
  0x14   : > { %s723_s6 = scalar_lea.hbm %s848_s0, %s434_s30  ;;  %s157_s7 = scalar_lea.vmem [#allocation2], %s417_s29 }
  0x15   : > { %s166_s8 = sshll.u32 %s157_s7, 4  ;;  %p729_p0 = pnand %p452_p13, %p695_p4  ;;  %s725_s8 = int_to_ptr.vmem [resolvable:$true] %s166_s8 }
  0x16   : > { %s734_s10 = scalar_lea.sflag [#allocation3], %s153_s28  ;;  %s514_s11 = scalar_lea.hbm %s723_s6, 512 }
  0x17   : > { %p515_p2 = scmp.ne.s32.totalorder %s723_s6, %s514_s11  ;;  %p516_p3 = pneg %p729_p0 }
  0x18   : > { %s519_s21 = scalar_lea.hbm %s848_s0, 1024  ;;  %p520_p4 = scmp.lt.u32.totalorder %s723_s6, %s848_s0 }
  0x19   : > { %p517_p5 = pnand %p516_p3, %p515_p2  ;;  %p521_p7 = scmp.lt.u32.totalorder %s519_s21, %s514_s11 }
  0x1a   : > { %p523_p13 = scmp.lt.u32.totalorder %s514_s11, %s723_s6 }
  0x1b   : > { %p518_p6 = pneg %p517_p5  ;;  %p522_p10 = por %p521_p7, %p520_p4 }
  0x1d   : > { %p524_p12 = por %p523_p13, %p522_p10 }
  0x1f   : > { %p525_p1 = pnand %p524_p12, %p518_p6 }
  0x21   : > { %528 = shalt.err (!%p525_p1)
}
  0x22   : > { %s529_s28 = scalar_lea.vmem %s725_s8, 512  ;;  %s628_s29 = smov [#allocation2]  }
  0x23   : > { %p530_p2 = scmp.ne.s32.totalorder %s725_s8, %s529_s28  ;;  %s534_s30 = sshll.u32 %s628_s29, 4  ;;  %s535_s30 = int_to_ptr.vmem [resolvable:$false] %s534_s30 }
  0x24   : > { %s536_s4 = scalar_lea.vmem %s535_s30, 1024  ;;  %p537_p9 = scmp.lt.s32.totalorder %s725_s8, %s535_s30 }
  0x25   : > { %p532_p5 = pnand %p530_p2, %p516_p3  ;;  %p538_p4 = scmp.lt.s32.totalorder %s536_s4, %s529_s28 }
  0x27   : > { %p533_p11 = pneg %p532_p5  ;;  %p539_p7 = por %p538_p4, %p537_p9 }
  0x29   : > { %p540_p10 = pnand %p539_p7, %p533_p11 }
  0x2b   : > { %543 = shalt.err (!%p540_p10)
}
  0x2c   : > { %s629_s5 = smov 128   ;;  %s630_s7 = smov 8  }
  0x2d   : > { %447 = dma.hbm_to_vmem [thread:$0]  (!%p729_p0), %s723_s6, 512, %s725_s8, %s734_s10, %s629_s5, %s629_s5, %s630_s7  }
  0x2e   : > { %p174_p12 = scmp.lt.s32.totalorder %s626_s17, 3  ;;  %p858_p1 = scmp.ge.s32.totalorder %s626_s17, 1 }
  0x30   : > { %p175_p3 = pnand %p858_p1, %p174_p12 }
  0x31   : > { %s766_s11 = sand.u32 (!%p175_p3), 1, %s610_s13  }
  0x32   : > { %178 = sbr.rel (%p175_p3) target bundleno = 397 (0x18d), region = 32  ;;  %s421_s18 = sshll.u32 (!%p175_p3), %s766_s11, 5 }
  0x33   : > { %s181_s19 = scalar_lea.sflag (!%p175_p3), [#allocation3], %s766_s11  ;;  %s184_s21 = scalar_lea.vmem (!%p175_p3), [#allocation2], %s421_s18 }
  0x39   : > { %597 = dma.done.wait (%p701_p8), %s181_s19, 512  }
  0x3a   : > { %599 = vsyncadd (%p701_p8), %s181_s19, 4294966784  ;;  %vm215_vm0 = vcmask 261120   ;;  %v209_v0 = vld [vmem:[%s184_s21] sm:$0xff]  ;;  %v211_v1 = vld [vmem:[%s184_s21 + $0x10] sm:$0xff]  ;;  %s422_s10 = sshll.u32 %s766_s11, 4  ;;  %vm305_vm1 = vcmask 257024  }
  0x3b   : > { %v210_v2 = vld [vmem:[%s184_s21 + $0x8] sm:$0xff]  ;;  %v216_v3 = vsel %vm215_vm0, %v209_v0, 0.0  ;;  %v222_v4 = vsel %vm215_vm0, %v211_v1, 0.0  ;;  %v212_v5 = vld [vmem:[%s184_s21 + $0x18] sm:$0xff]  ;;  %v423_v41 = vld [vmem:[%s849_s1] ss:$0 sm:$0xff] }
  0x3c   : > { %217 = vadd.xlane.f32.xlu0 %v216_v3  ;;  %223 = vadd.xlane.f32.xlu1 %v222_v4  ;;  %v219_v6 = vsel %vm215_vm0, %v210_v2, 0.0  ;;  %v225_v7 = vsel %vm215_vm0, %v212_v5, 0.0  ;;  %v424_v43 = vld [vmem:[%s850_s2] ss:$0 sm:$0xff]  ;;  %s206_s22 = scalar_lea.vmem [#allocation5], %s422_s10  ;;  %s439_s23 = sshll.u32 %s618_s15, 8 }
  0x3d   : > { %s326_s28 = sshll.u32 %s206_s22, 4  ;;  %s796_s4 = scalar_lea.hbm %s851_s3, %s439_s23  ;;  %s798_s28 = int_to_ptr.vmem [resolvable:$true] %s326_s28 }
  0x3e   : > { %s311_s15 = scalar_lea.sflag [#allocation4], %s766_s11  ;;  %s544_s5 = scalar_lea.vmem %s798_s28, 256 }
  0x3f   : > { %p545_p8 = scmp.ne.s32.totalorder %s798_s28, %s544_s5  ;;  %p859_p9 = scmp.ne.s32.totalorder %s855_s25, 0 }
  0x40   : > { %220 = vadd.xlane.f32.xlu0 %v219_v6  ;;  %226 = vadd.xlane.f32.xlu1 %v225_v7  ;;  %s631_s7 = smov [#allocation5]  }
  0x41   : > { %p546_p11 = pnand %p545_p8, %p859_p9  ;;  %s548_s18 = sshll.u32 %s631_s7, 4  ;;  %s549_s18 = int_to_ptr.vmem [resolvable:$false] %s548_s18 }
  0x42   : > { %s550_s19 = scalar_lea.vmem %s549_s18, 512  ;;  %p551_p6 = scmp.lt.s32.totalorder %s798_s28, %s549_s18 }
  0x43   : > { %p547_p0 = pneg %p546_p11  ;;  %p552_p13 = scmp.lt.s32.totalorder %s550_s19, %s544_s5 }
  0x45   : > { %p553_p2 = por %p552_p13, %p551_p6 }
  0x47   : > { %p554_p5 = pnand %p553_p2, %p547_p0 }
  0xc9   : > { %v218_v8 = vpop.xlane.xlu0 %217  ;;  %v224_v9 = vpop.xlane.xlu1 %223 }
  0xca   : > { %v229_v10 = vmul.f32 0.03125, %v218_v8  ;;  %v231_v11 = vmul.f32 0.03125, %v224_v9 }
  0xcc   : > { %v233_v12 = vsub.f32 %v209_v0, %v229_v10  ;;  %v235_v13 = vsub.f32 %v211_v1, %v231_v11 }
  0xcd   : > { %v221_v14 = vpop.xlane.xlu0 %220  ;;  %v227_v15 = vpop.xlane.xlu1 %226 }
  0xce   : > { %v230_v16 = vmul.f32 0.03125, %v221_v14  ;;  %v232_v17 = vmul.f32 0.03125, %v227_v15  ;;  %v237_v18 = vmul.f32 %v233_v12, %v233_v12  ;;  %v239_v19 = vmul.f32 %v235_v13, %v235_v13 }
  0xd0   : > { %v234_v20 = vsub.f32 %v210_v2, %v230_v16  ;;  %v236_v21 = vsub.f32 %v212_v5, %v232_v17  ;;  %v241_v22 = vsel %vm215_vm0, %v237_v18, 0.0  ;;  %v247_v23 = vsel %vm215_vm0, %v239_v19, 0.0 }
  0xd1   : > { %242 = vadd.xlane.f32.xlu0 %v241_v22 }
  0xd2   : > { %v238_v24 = vmul.f32 %v234_v20, %v234_v20  ;;  %v240_v25 = vmul.f32 %v236_v21, %v236_v21 }
  0xd4   : > { %v244_v26 = vsel %vm215_vm0, %v238_v24, 0.0  ;;  %v250_v27 = vsel %vm215_vm0, %v240_v25, 0.0 }
  0xd5   : > { %248 = vadd.xlane.f32.xlu0 %v247_v23  ;;  %245 = vadd.xlane.f32.xlu1 %v244_v26 }
  0xd9   : > { %251 = vadd.xlane.f32.xlu1 %v250_v27 }
 0x15e   : > { %v243_v28 = vpop.xlane.xlu0 %242 }
 0x15f   : > { %v253_v29 = vmul.f32 0.03125, %v243_v28 }
 0x161   : > { %v257_v30 = vadd.f32 1e-05, %v253_v29 }
 0x162   : > { %v246_v31 = vpop.xlane.xlu1 %245  ;;  %v249_v32 = vpop.xlane.xlu0 %248 }
 0x163   : > { %506 = vrsqrt.f32 %v257_v30  ;;  %v254_v33 = vmul.f32 0.03125, %v246_v31  ;;  %v255_v34 = vmul.f32 0.03125, %v249_v32 }
 0x165   : > { %v258_v35 = vadd.f32 1e-05, %v254_v33  ;;  %v259_v36 = vadd.f32 1e-05, %v255_v34 }
 0x166   : > { %v252_v37 = vpop.xlane.xlu1 %251 }
 0x167   : > { %508 = vrsqrt.f32 %v258_v35  ;;  %v256_v38 = vmul.f32 0.03125, %v252_v37 }
 0x168   : > { %510 = vrsqrt.f32 %v259_v36 }
 0x169   : > { %v260_v39 = vadd.f32 1e-05, %v256_v38 }
 0x16b   : > { %512 = vrsqrt.f32 %v260_v39 }
 0x16d   : > { %v507_v40 = vpop.eup %506 }
 0x16e   : > { %v265_v42 = vmul.f32 %v507_v40, %v233_v12 }
 0x170   : > { %v275_v44 = vmul.f32 %v423_v41, %v265_v42 }
 0x171   : > { %v509_v45 = vpop.eup %508 }
 0x172   : > { %v511_v46 = vpop.eup %510  ;;  %v285_v47 = vadd.f32 %v424_v43, %v275_v44  ;;  %v266_v48 = vmul.f32 %v509_v45, %v234_v20 }
 0x173   : > { %v267_v49 = vmul.f32 %v511_v46, %v235_v13 }
 0x174   : > { %v435_v50 = vpack.c.bf16 %v285_v47, %v285_v47  ;;  %v276_v51 = vmul.f32 %v423_v41, %v266_v48 }
 0x175   : > { %v513_v52 = vpop.eup %512  ;;  %v277_v53 = vmul.f32 %v423_v41, %v267_v49 }
 0x176   : > { %v286_v54 = vadd.f32 %v424_v43, %v276_v51  ;;  %306 = vst.msk [vmem:[%s206_s22] sm:$0xf] %vm305_vm1, %v435_v50  ;;  %v268_v55 = vmul.f32 %v513_v52, %v236_v21 }
 0x177   : > { %v287_v56 = vadd.f32 %v424_v43, %v277_v53 }
 0x178   : > { %v436_v57 = vpack.c.bf16 %v286_v54, %v286_v54  ;;  %v278_v58 = vmul.f32 %v423_v41, %v268_v55 }
 0x179   : > { %v437_v59 = vpack.c.bf16 %v287_v56, %v287_v56 }
 0x17a   : > { %307 = vst.msk [vmem:[%s206_s22 + $0x4] sm:$0xf] %vm305_vm1, %v436_v57  ;;  %v288_v60 = vadd.f32 %v424_v43, %v278_v58 }
 0x17b   : > { %308 = vst.msk [vmem:[%s206_s22 + $0x8] sm:$0xf] %vm305_vm1, %v437_v59 }
 0x17c   : > { %v438_v61 = vpack.c.bf16 %v288_v60, %v288_v60 }
 0x17e   : > { %309 = vst.msk [vmem:[%s206_s22 + $0xc] sm:$0xf] %vm305_vm1, %v438_v61 }
 0x17f   : > { %557 = shalt.err (!%p554_p5)
}
 0x180   : > { %s558_s21 = scalar_lea.hbm %s796_s4, 256  ;;  %s562_s8 = scalar_lea.hbm %s851_s3, 512 }
 0x181   : > { %p559_p4 = scmp.ne.s32.totalorder %s796_s4, %s558_s21  ;;  %p563_p12 = scmp.lt.u32.totalorder %s796_s4, %s851_s3 }
 0x182   : > { %p564_p1 = scmp.lt.u32.totalorder %s562_s8, %s558_s21  ;;  %p566_p8 = scmp.lt.u32.totalorder %s558_s21, %s796_s4 }
 0x183   : > { %p560_p7 = pnand %p559_p4, %p859_p9 }
 0x184   : > { %p565_p3 = por %p564_p1, %p563_p12 }
 0x185   : > { %p561_p10 = pneg %p560_p7 }
 0x186   : > { %p567_p11 = por %p566_p8, %p565_p3 }
 0x188   : > { %p568_p0 = pnand %p567_p11, %p561_p10 }
 0x18a   : > { %571 = shalt.err (!%p568_p0)
}
 0x18b   : > { %s632_s22 = smov 64   ;;  %s633_s23 = smov 4  }
 0x18c   : > { %442 = dma.vmem_to_hbm [thread:$0]  (%p859_p9), %s798_s28, 256, %s796_s4, %s311_s15, %s632_s22, %s632_s22, %s633_s23  }
 0x18d PF: > { %s341_s29 = sand.u32 1, %s606_s12   ;;  %p860_p6 = scmp.ne.s32.totalorder %s856_s27, 0 }
 0x18e   : > { %p861_p13 = scmp.ge.s32.totalorder %s626_s17, 2  ;;  %s342_s30 = scalar_lea.sflag [#allocation4], %s341_s29 }
 0x190   : > { %p449_p2 = pnand %p861_p13, %p860_p6 }
 0x192   : > { %601 = dma.done.wait (!%p449_p2), %s342_s30, 256  }
 0x193   : > { %603 = vsyncadd (!%p449_p2), %s342_s30, 4294967040  ;;  %s19_s17 = sadd.s32 1, %s626_s17   ;;  %s862_s12 = smov %s610_s13 }
 0x194   : > { %p16_p5 = scmp.ge.s32.totalorder %s19_s17, 4   ;;  %s863_s13 = smov %s614_s14 }
 0x195   : > { %s864_s14 = smov %s710_s26  ;;  %s865_s15 = smov %s622_s16 }
 0x196   : > { %s866_s16 = smov %s868_s20  ;;  %18 = sbr.rel (!%p16_p5) target bundleno = 6 (0x6), region = 77 }
 0x19d   :  { %347 = vsyncpa [#allocation3], 1 }
 0x19e   :  { %349 = vsyncpa [#allocation3 + $0x1], 1 }
 0x19f   :  { %350 = vsyncpa [#allocation4], 1 }
 0x1a0   :  { %352 = vsyncpa [#allocation4 + $0x1], 1 }

</bundles_post_ra>
